<compile_context>
chip_gen: v6e
topology: v6e:2x2x1
jax: 0.10.0
libtpu: 0.0.40
codegen_flags: <defaults>
</compile_context>

<pallas_src>
import functools
import math

import jax
import jax.numpy as jnp
from jax import lax
from jax.experimental import pallas as pl
from jax.experimental.pallas import tpu as pltpu


def _flash_attention_kernel(xq_ref, xkv_ref, wq_ref, bq_ref, wkv_ref, bkv_ref,
                            o_ref, q_s, m_s, l_s, acc_s):
    """One (batch, q-tile) block; loops over KV tiles along grid axis 2."""
    kv_idx = pl.program_id(2)
    h = q_s.shape[-1]

    @pl.when(kv_idx == 0)
    def _init():
        # Q projection.  wq is already (in, out) and pre-scaled by 1/sqrt(H),
        # so there is no in-kernel transpose and no score scaling later.
        q_s[...] = (
            jnp.dot(xq_ref[...], wq_ref[...], preferred_element_type=jnp.float32)
            + bq_ref[...]
        )
        m_s[...] = jnp.full_like(m_s, -jnp.inf)
        l_s[...] = jnp.zeros_like(l_s)
        acc_s[...] = jnp.zeros_like(acc_s)

    # K and V projections for this KV tile: one stacked (TK, 2H) matmul.
    kvp = (
        jnp.dot(xkv_ref[...], wkv_ref[...], preferred_element_type=jnp.float32)
        + bkv_ref[...]
    )
    k = kvp[:, :h]
    v = kvp[:, h:]

    # scores = Q K^T, contracting the last axes directly (no materialized K.T).
    s = lax.dot_general(q_s[...], k, (((1,), (1,)), ((), ())),
                        preferred_element_type=jnp.float32)

    # Online (flash) softmax update, all in f32.
    m_new = jnp.maximum(m_s[...], jnp.max(s, axis=-1, keepdims=True))
    alpha = jnp.exp(m_s[...] - m_new)
    p = jnp.exp(s - m_new)
    l_s[...] = alpha * l_s[...] + jnp.sum(p, axis=-1, keepdims=True)
    acc_s[...] = alpha * acc_s[...] + jnp.dot(
        p.astype(v.dtype), v, preferred_element_type=jnp.float32)
    m_s[...] = m_new

    @pl.when(kv_idx == pl.num_programs(2) - 1)
    def _finalize():
        inv_l = pl.reciprocal(l_s[...], approx=True)   # EUP slot, ~free
        o_ref[...] = (acc_s[...] * inv_l).astype(o_ref.dtype)


def _pick_tile(extent, cap):
    """Largest multiple-of-8 tile <= cap that divides extent (else full extent)."""
    if extent <= cap:
        return extent
    for t in range(min(cap, extent), 7, -1):
        if t % 8 == 0 and extent % t == 0:
            return t
    return extent


def attention_forward(x, wq, bq, wk, bk, wv, bv, *, q_tile=256, kv_tile=512):
    """x: (B, S, H); w*: (H, H) in nn.Linear (out, in) layout; b*: (H,)."""
    B, S, H = x.shape
    scale = 1.0 / math.sqrt(float(H))

    # One-time weight prep (runs once outside the kernel, not B*S/TQ times):
    #  * fold the 1/sqrt(H) score scale into the Q projection,
    #  * transpose to (in, out) so the kernel never transposes on the XLU,
    #  * stack K/V weights into one (H, 2H) matrix -> single wider MXU matmul.
    wq_t = (wq * scale).T                          # (H, H)
    bq_r = (bq * scale).reshape(1, H)
    wkv_t = jnp.concatenate([wk.T, wv.T], axis=1)  # (H, 2H)
    bkv_r = jnp.concatenate([bk, bv]).reshape(1, 2 * H)

    TQ = _pick_tile(S, q_tile)
    TK = _pick_tile(S, kv_tile)
    grid = (B, S // TQ, S // TK)

    # TODO(synk): on v6e/v7x callers can pass bf16 x / weights for ~2x MXU
    # throughput; softmax and the accumulator here are already f32 either way.

    xq_spec = pl.BlockSpec((None, TQ, H), lambda b, qi, ki: (b, qi, 0))
    xkv_spec = pl.BlockSpec((None, TK, H), lambda b, qi, ki: (b, ki, 0))
    wq_spec = pl.BlockSpec((H, H), lambda b, qi, ki: (0, 0))
    bq_spec = pl.BlockSpec((1, H), lambda b, qi, ki: (0, 0))
    wkv_spec = pl.BlockSpec((H, 2 * H), lambda b, qi, ki: (0, 0))
    bkv_spec = pl.BlockSpec((1, 2 * H), lambda b, qi, ki: (0, 0))
    o_spec = pl.BlockSpec((None, TQ, H), lambda b, qi, ki: (b, qi, 0))

    cost = pl.CostEstimate(
        flops=6 * B * S * H * H + 4 * B * S * S * H,
        transcendentals=B * S * S,
        bytes_accessed=4 * (3 * B * S * H + 3 * H * H + 3 * H),
    )

    return pl.pallas_call(
        _flash_attention_kernel,
        out_shape=jax.ShapeDtypeStruct((B, S, H), x.dtype),
        grid_spec=pltpu.PrefetchScalarGridSpec(
            num_scalar_prefetch=0,
            grid=grid,
            in_specs=[xq_spec, xkv_spec, wq_spec, bq_spec, wkv_spec, bkv_spec],
            out_specs=o_spec,
            scratch_shapes=[
                pltpu.VMEM((TQ, H), jnp.float32),   # cached Q tile
                pltpu.VMEM((TQ, 1), jnp.float32),   # running max
                pltpu.VMEM((TQ, 1), jnp.float32),   # running sum
                pltpu.VMEM((TQ, H), jnp.float32),   # output accumulator
            ],
        ),
        compiler_params=pltpu.CompilerParams(
            dimension_semantics=("parallel", "parallel", "arbitrary"),
            vmem_limit_bytes=48 * 1024 * 1024,
        ),
        cost_estimate=cost,
    )(x, x, wq_t, bq_r, wkv_t, bkv_r)


def reference_forward(x, wq, bq, wk, bk, wv, bv):
    H = x.shape[-1]
    q = x @ wq.T + bq
    k = x @ wk.T + bk
    v = x @ wv.T + bv
    scores = (q @ jnp.swapaxes(k, -2, -1)) / jnp.sqrt(jnp.float32(H))
    attn = jax.nn.softmax(scores, axis=-1)
    return attn @ v


def _make_inputs(key, B, S, H):
    kx, kq, kbq, kk, kbk, kv, kbv = jax.random.split(key, 7)
    bound = 1.0 / math.sqrt(H)   # mimics nn.Linear's uniform init
    x = jax.random.normal(kx, (B, S, H), dtype=jnp.float32)
    wq = jax.random.uniform(kq, (H, H), jnp.float32, -bound, bound)
    bq = jax.random.uniform(kbq, (H,), jnp.float32, -bound, bound)
    wk = jax.random.uniform(kk, (H, H), jnp.float32, -bound, bound)
    bk = jax.random.uniform(kbk, (H,), jnp.float32, -bound, bound)
    wv = jax.random.uniform(kv, (H, H), jnp.float32, -bound, bound)
    bv = jax.random.uniform(kbv, (H,), jnp.float32, -bound, bound)
    return x, wq, bq, wk, bk, wv, bv


if __name__ == "__main__":
    key = jax.random.PRNGKey(0)
    k1, k2 = jax.random.split(key)

    # Small shape implied by the module: batch=2, seq=8, hidden=32.
    args = _make_inputs(k1, 2, 8, 32)
    out = jax.block_until_ready(attention_forward(*args))
    ref = reference_forward(*args)
    assert out.shape == (2, 8, 32)
    # Tolerance accounts for the approximate EUP reciprocal in the softmax
    # denominator (typical error is far smaller).
    assert jnp.allclose(out, ref, atol=2e-3, rtol=2e-3), "mismatch (small)"

    # Larger shape exercising the multi-tile flash path (grid = (2, 2, 2)).
    args = _make_inputs(k2, 2, 256, 128)
    out = jax.block_until_ready(attention_forward(*args, q_tile=128, kv_tile=128))
    ref = reference_forward(*args)
    assert jnp.allclose(out, ref, atol=2e-3, rtol=2e-3), "mismatch (tiled)"

    print("KERNEL_OK")
</pallas_src>

<mosaic_0001>
module attributes {stable_mosaic.version = 11 : i64} {
  func.func @_flash_attention_kernel(%arg0: i32, %arg1: i32, %arg2: i32, %arg3: memref<1x8x32xf32, #tpu.memory_space<vmem>>, %arg4: memref<1x8x32xf32, #tpu.memory_space<vmem>>, %arg5: memref<32x32xf32, #tpu.memory_space<vmem>>, %arg6: memref<1x32xf32, #tpu.memory_space<vmem>>, %arg7: memref<32x64xf32, #tpu.memory_space<vmem>>, %arg8: memref<1x64xf32, #tpu.memory_space<vmem>>, %arg9: memref<1x8x32xf32, #tpu.memory_space<vmem>>, %arg10: memref<8x32xf32, #tpu.memory_space<vmem>>, %arg11: memref<8x1xf32, #tpu.memory_space<vmem>>, %arg12: memref<8x1xf32, #tpu.memory_space<vmem>>, %arg13: memref<8x32xf32, #tpu.memory_space<vmem>>) attributes {dimension_semantics = [#tpu.dimension_semantics<parallel>, #tpu.dimension_semantics<parallel>, #tpu.dimension_semantics<arbitrary>], iteration_bounds = array<i64: 2, 1, 1>, scalar_prefetch = 0 : i64, scratch_operands = 4 : i64, tpu.core_type = #tpu.core_type<tc>, window_params = [{transform_indices = @transform_0, window_bounds = array<i64: 1, 8, 32>}, {transform_indices = @transform_1, window_bounds = array<i64: 1, 8, 32>}, {pipeline_mode = #tpu.pipeline_mode<synchronous>, transform_indices = @transform_2, window_bounds = array<i64: 32, 32>}, {pipeline_mode = #tpu.pipeline_mode<synchronous>, transform_indices = @transform_3, window_bounds = array<i64: 1, 32>}, {pipeline_mode = #tpu.pipeline_mode<synchronous>, transform_indices = @transform_4, window_bounds = array<i64: 32, 64>}, {pipeline_mode = #tpu.pipeline_mode<synchronous>, transform_indices = @transform_5, window_bounds = array<i64: 1, 64>}, {transform_indices = @transform_6, window_bounds = array<i64: 1, 8, 32>}]} {
    %c0_i32 = arith.constant 0 : i32
    %0 = arith.cmpi eq, %arg2, %c0_i32 : i32
    %1 = arith.extui %0 : i1 to i32
    %c0_i32_0 = arith.constant 0 : i32
    %2 = arith.cmpi ne, %1, %c0_i32_0 : i32
    scf.if %2 {
      %c0_29 = arith.constant 0 : index
      %c0_30 = arith.constant 0 : index
      %c0_31 = arith.constant 0 : index
      %40 = vector.load %arg3[%c0_29, %c0_30, %c0_31] : memref<1x8x32xf32, #tpu.memory_space<vmem>>, vector<1x8x32xf32>
      %41 = vector.shape_cast %40 : vector<1x8x32xf32> to vector<8x32xf32>
      %c0_32 = arith.constant 0 : index
      %c0_33 = arith.constant 0 : index
      %42 = vector.load %arg5[%c0_32, %c0_33] : memref<32x32xf32, #tpu.memory_space<vmem>>, vector<32x32xf32>
      %cst_34 = arith.constant dense<0.000000e+00> : vector<8x32xf32>
      %43 = tpu.matmul %41, %42, %cst_34 {dimension_numbers = #tpu.dot_dimension_numbers<[1], [0], [0], [1], [0, 0, 1, 1], [], []>} : vector<8x32xf32>, vector<32x32xf32>, vector<8x32xf32> -> vector<8x32xf32>
      %c0_35 = arith.constant 0 : index
      %c0_36 = arith.constant 0 : index
      %44 = vector.load %arg6[%c0_35, %c0_36] : memref<1x32xf32, #tpu.memory_space<vmem>>, vector<1x32xf32>
      %45 = vector.broadcast %44 : vector<1x32xf32> to vector<8x32xf32>
      %46 = arith.addf %43, %45 : vector<8x32xf32>
      %c0_37 = arith.constant 0 : index
      %c0_38 = arith.constant 0 : index
      %47 = vector.load %arg10[%c0_37, %c0_38] : memref<8x32xf32, #tpu.memory_space<vmem>>, vector<8x32xf32>
      tpu.vector_store %arg10[%c0_37, %c0_38], %46 {strides = array<i32>} : memref<8x32xf32, #tpu.memory_space<vmem>>, vector<8x32xf32>,
      %cst_39 = arith.constant 0xFF800000 : f32
      %48 = vector.broadcast %cst_39 : f32 to vector<8x1xf32>
      %c0_40 = arith.constant 0 : index
      %c0_41 = arith.constant 0 : index
      %49 = vector.load %arg11[%c0_40, %c0_41] : memref<8x1xf32, #tpu.memory_space<vmem>>, vector<8x1xf32>
      tpu.vector_store %arg11[%c0_40, %c0_41], %48 {strides = array<i32>} : memref<8x1xf32, #tpu.memory_space<vmem>>, vector<8x1xf32>,
      %cst_42 = arith.constant 0.000000e+00 : f32
      %50 = vector.broadcast %cst_42 : f32 to vector<8x1xf32>
      %c0_43 = arith.constant 0 : index
      %c0_44 = arith.constant 0 : index
      %51 = vector.load %arg12[%c0_43, %c0_44] : memref<8x1xf32, #tpu.memory_space<vmem>>, vector<8x1xf32>
      tpu.vector_store %arg12[%c0_43, %c0_44], %50 {strides = array<i32>} : memref<8x1xf32, #tpu.memory_space<vmem>>, vector<8x1xf32>,
      %cst_45 = arith.constant 0.000000e+00 : f32
      %52 = vector.broadcast %cst_45 : f32 to vector<8x32xf32>
      %c0_46 = arith.constant 0 : index
      %c0_47 = arith.constant 0 : index
      %53 = vector.load %arg13[%c0_46, %c0_47] : memref<8x32xf32, #tpu.memory_space<vmem>>, vector<8x32xf32>
      tpu.vector_store %arg13[%c0_46, %c0_47], %52 {strides = array<i32>} : memref<8x32xf32, #tpu.memory_space<vmem>>, vector<8x32xf32>,
    } else {
    }
    %c0 = arith.constant 0 : index
    %c0_1 = arith.constant 0 : index
    %c0_2 = arith.constant 0 : index
    %3 = vector.load %arg4[%c0, %c0_1, %c0_2] : memref<1x8x32xf32, #tpu.memory_space<vmem>>, vector<1x8x32xf32>
    %4 = vector.shape_cast %3 : vector<1x8x32xf32> to vector<8x32xf32>
    %c0_3 = arith.constant 0 : index
    %c0_4 = arith.constant 0 : index
    %5 = vector.load %arg7[%c0_3, %c0_4] : memref<32x64xf32, #tpu.memory_space<vmem>>, vector<32x64xf32>
    %cst = arith.constant dense<0.000000e+00> : vector<8x64xf32>
    %6 = tpu.matmul %4, %5, %cst {dimension_numbers = #tpu.dot_dimension_numbers<[1], [0], [0], [1], [0, 0, 1, 1], [], []>} : vector<8x32xf32>, vector<32x64xf32>, vector<8x64xf32> -> vector<8x64xf32>
    %c0_5 = arith.constant 0 : index
    %c0_6 = arith.constant 0 : index
    %7 = vector.load %arg8[%c0_5, %c0_6] : memref<1x64xf32, #tpu.memory_space<vmem>>, vector<1x64xf32>
    %8 = vector.broadcast %7 : vector<1x64xf32> to vector<8x64xf32>
    %9 = arith.addf %6, %8 : vector<8x64xf32>
    %10 = vector.extract_strided_slice %9 {offsets = [0, 0], sizes = [8, 32], strides = [1, 1]} : vector<8x64xf32> to vector<8x32xf32>
    %11 = vector.extract_strided_slice %9 {offsets = [0, 32], sizes = [8, 32], strides = [1, 1]} : vector<8x64xf32> to vector<8x32xf32>
    %c0_7 = arith.constant 0 : index
    %c0_8 = arith.constant 0 : index
    %12 = vector.load %arg10[%c0_7, %c0_8] : memref<8x32xf32, #tpu.memory_space<vmem>>, vector<8x32xf32>
    %cst_9 = arith.constant dense<0.000000e+00> : vector<8x8xf32>
    %13 = tpu.matmul %12, %10, %cst_9 {dimension_numbers = #tpu.dot_dimension_numbers<[1], [1], [0], [0], [0, 0, 1, 0], [], []>} : vector<8x32xf32>, vector<8x32xf32>, vector<8x8xf32> -> vector<8x8xf32>
    %c0_10 = arith.constant 0 : index
    %c0_11 = arith.constant 0 : index
    %14 = vector.load %arg11[%c0_10, %c0_11] : memref<8x1xf32, #tpu.memory_space<vmem>>, vector<8x1xf32>
    %cst_12 = arith.constant dense<0xFF800000> : vector<8xf32>
    %15 = vector.multi_reduction <maximumf>, %13, %cst_12 [1] : vector<8x8xf32> to vector<8xf32>
    %16 = vector.shape_cast %15 : vector<8xf32> to vector<8x1xf32>
    %17 = arith.maximumf %14, %16 : vector<8x1xf32>
    %c0_13 = arith.constant 0 : index
    %c0_14 = arith.constant 0 : index
    %18 = vector.load %arg11[%c0_13, %c0_14] : memref<8x1xf32, #tpu.memory_space<vmem>>, vector<8x1xf32>
    %19 = arith.subf %18, %17 : vector<8x1xf32>
    %20 = math.exp %19 : vector<8x1xf32>
    %21 = vector.broadcast %17 : vector<8x1xf32> to vector<8x8xf32>
    %22 = arith.subf %13, %21 : vector<8x8xf32>
    %23 = math.exp %22 : vector<8x8xf32>
    %c0_15 = arith.constant 0 : index
    %c0_16 = arith.constant 0 : index
    %24 = vector.load %arg12[%c0_15, %c0_16] : memref<8x1xf32, #tpu.memory_space<vmem>>, vector<8x1xf32>
    %25 = arith.mulf %20, %24 : vector<8x1xf32>
    %cst_17 = arith.constant dense<0.000000e+00> : vector<8xf32>
    %26 = vector.multi_reduction <add>, %23, %cst_17 [1] : vector<8x8xf32> to vector<8xf32>
    %27 = vector.shape_cast %26 : vector<8xf32> to vector<8x1xf32>
    %28 = arith.addf %25, %27 : vector<8x1xf32>
    %c0_18 = arith.constant 0 : index
    %c0_19 = arith.constant 0 : index
    %29 = vector.load %arg12[%c0_18, %c0_19] : memref<8x1xf32, #tpu.memory_space<vmem>>, vector<8x1xf32>
    tpu.vector_store %arg12[%c0_18, %c0_19], %28 {strides = array<i32>} : memref<8x1xf32, #tpu.memory_space<vmem>>, vector<8x1xf32>,
    %c0_20 = arith.constant 0 : index
    %c0_21 = arith.constant 0 : index
    %30 = vector.load %arg13[%c0_20, %c0_21] : memref<8x32xf32, #tpu.memory_space<vmem>>, vector<8x32xf32>
    %31 = vector.broadcast %20 : vector<8x1xf32> to vector<8x32xf32>
    %32 = arith.mulf %31, %30 : vector<8x32xf32>
    %cst_22 = arith.constant dense<0.000000e+00> : vector<8x32xf32>
    %33 = tpu.matmul %23, %11, %cst_22 {dimension_numbers = #tpu.dot_dimension_numbers<[1], [0], [0], [1], [0, 0, 1, 1], [], []>} : vector<8x8xf32>, vector<8x32xf32>, vector<8x32xf32> -> vector<8x32xf32>
    %34 = arith.addf %32, %33 : vector<8x32xf32>
    %c0_23 = arith.constant 0 : index
    %c0_24 = arith.constant 0 : index
    %35 = vector.load %arg13[%c0_23, %c0_24] : memref<8x32xf32, #tpu.memory_space<vmem>>, vector<8x32xf32>
    tpu.vector_store %arg13[%c0_23, %c0_24], %34 {strides = array<i32>} : memref<8x32xf32, #tpu.memory_space<vmem>>, vector<8x32xf32>,
    %c0_25 = arith.constant 0 : index
    %c0_26 = arith.constant 0 : index
    %36 = vector.load %arg11[%c0_25, %c0_26] : memref<8x1xf32, #tpu.memory_space<vmem>>, vector<8x1xf32>
    tpu.vector_store %arg11[%c0_25, %c0_26], %17 {strides = array<i32>} : memref<8x1xf32, #tpu.memory_space<vmem>>, vector<8x1xf32>,
    %c0_i32_27 = arith.constant 0 : i32
    %37 = arith.cmpi eq, %arg2, %c0_i32_27 : i32
    %38 = arith.extui %37 : i1 to i32
    %c0_i32_28 = arith.constant 0 : i32
    %39 = arith.cmpi ne, %38, %c0_i32_28 : i32
    scf.if %39 {
      %c0_29 = arith.constant 0 : index
      %c0_30 = arith.constant 0 : index
      %40 = vector.load %arg12[%c0_29, %c0_30] : memref<8x1xf32, #tpu.memory_space<vmem>>, vector<8x1xf32>
      %41 = tpu.reciprocal %40 {approx = true} : vector<8x1xf32> -> vector<8x1xf32>
      %c0_31 = arith.constant 0 : index
      %c0_32 = arith.constant 0 : index
      %42 = vector.load %arg13[%c0_31, %c0_32] : memref<8x32xf32, #tpu.memory_space<vmem>>, vector<8x32xf32>
      %43 = vector.broadcast %41 : vector<8x1xf32> to vector<8x32xf32>
      %44 = arith.mulf %42, %43 : vector<8x32xf32>
      %c0_33 = arith.constant 0 : index
      %c0_34 = arith.constant 0 : index
      %c0_35 = arith.constant 0 : index
      %45 = vector.load %arg9[%c0_33, %c0_34, %c0_35] : memref<1x8x32xf32, #tpu.memory_space<vmem>>, vector<1x8x32xf32>
      %46 = vector.shape_cast %45 : vector<1x8x32xf32> to vector<8x32xf32>
      %47 = vector.shape_cast %44 : vector<8x32xf32> to vector<1x8x32xf32>
      tpu.vector_store %arg9[%c0_33, %c0_34, %c0_35], %47 {strides = array<i32>} : memref<1x8x32xf32, #tpu.memory_space<vmem>>, vector<1x8x32xf32>,
    } else {
    }
    return
  }
  func.func @transform_0(%arg0: i32, %arg1: i32, %arg2: i32) -> (i32, i32, i32) {
    %c0_i32 = arith.constant 0 : i32
    %c0_i32_0 = arith.constant 0 : i32
    return %arg0, %arg1, %c0_i32 : i32, i32, i32
  }
  func.func @transform_1(%arg0: i32, %arg1: i32, %arg2: i32) -> (i32, i32, i32) {
    %c0_i32 = arith.constant 0 : i32
    %c0_i32_0 = arith.constant 0 : i32
    return %arg0, %arg2, %c0_i32 : i32, i32, i32
  }
  func.func @transform_2(%arg0: i32, %arg1: i32, %arg2: i32) -> (i32, i32) {
    %c0_i32 = arith.constant 0 : i32
    %c0_i32_0 = arith.constant 0 : i32
    %c0_i32_1 = arith.constant 0 : i32
    return %c0_i32, %c0_i32_0 : i32, i32
  }
  func.func @transform_3(%arg0: i32, %arg1: i32, %arg2: i32) -> (i32, i32) {
    %c0_i32 = arith.constant 0 : i32
    %c0_i32_0 = arith.constant 0 : i32
    %c0_i32_1 = arith.constant 0 : i32
    return %c0_i32, %c0_i32_0 : i32, i32
  }
  func.func @transform_4(%arg0: i32, %arg1: i32, %arg2: i32) -> (i32, i32) {
    %c0_i32 = arith.constant 0 : i32
    %c0_i32_0 = arith.constant 0 : i32
    %c0_i32_1 = arith.constant 0 : i32
    return %c0_i32, %c0_i32_0 : i32, i32
  }
  func.func @transform_5(%arg0: i32, %arg1: i32, %arg2: i32) -> (i32, i32) {
    %c0_i32 = arith.constant 0 : i32
    %c0_i32_0 = arith.constant 0 : i32
    %c0_i32_1 = arith.constant 0 : i32
    return %c0_i32, %c0_i32_0 : i32, i32
  }
  func.func @transform_6(%arg0: i32, %arg1: i32, %arg2: i32) -> (i32, i32, i32) {
    %c0_i32 = arith.constant 0 : i32
    %c0_i32_0 = arith.constant 0 : i32
    return %arg0, %arg1, %c0_i32 : i32, i32, i32
  }
}

</mosaic_0001>

<bundles_post_ra>
// kernel: tpu_custom_call.1
= control target key start
LH: loop header
LB: loop body
LE: loop exit
PB: predicated region body
PF: predicated region fallthrough
CT: control target
= control target key end

     0   :  { %s1536_s0 = inlined_call_operand.hbm [shape: f32[2,8,32], index: 0, kind: input, shape index: {}]   ;;  %s1537_s1 = inlined_call_operand.hbm [shape: f32[2,8,32], index: 1, kind: input, shape index: {}]   ;;  %s1538_s2 = inlined_call_operand.hbm [shape: f32[32,32], index: 2, kind: input, shape index: {}]   ;;  %s1539_s3 = inlined_call_operand.vmem [shape: f32[1,32], index: 3, kind: input, shape index: {}]   ;;  %s1540_s4 = inlined_call_operand.hbm [shape: f32[32,64], index: 4, kind: input, shape index: {}]   ;;  %s1541_s5 = inlined_call_operand.vmem [shape: f32[1,64], index: 5, kind: input, shape index: {}]   ;;  %s1542_s6 = inlined_call_operand.hbm [shape: f32[2,8,32], index: 6, kind: output, shape index: {}]  }
   0x1   :  { %1544 = sst [smem:[#allocation20_spill]] %s1536_s0 }
   0x2   :  { %1545 = sst [smem:[#allocation21_spill]] %s1537_s1 }
   0x3   :  { %1546 = sst [smem:[#allocation22_spill]] %s1538_s2 }
   0x4   :  { %1547 = sst [smem:[#allocation23_spill]] %s1540_s4 }
   0x5   :  { %11 = vsyncpa [#allocation7], 0 }
   0x6   :  { %13 = vsyncpa [#allocation7 + $0x1], 0 }
   0x7   :  { %14 = vsyncpa [#allocation10], 0 }
   0x8   :  { %16 = vsyncpa [#allocation10 + $0x1], 0 }
   0x9   :  { %17 = vsyncpa [#allocation13], 0 }
   0xa   :  { %18 = vsyncpa [#allocation8], 0 }
   0xb   :  { %20 = vsyncpa [#allocation8 + $0x1], 0  ;;  %s1308_s21 = smov 0   ;;  %s1310_s22 = smov 0  }
   0xc   :  { %s1312_s23 = smov 0   ;;  %s1314_s24 = smov 0  }
   0xd   :  { %s1316_s25 = smov 0   ;;  %s1318_s26 = smov 0  }
   0xe LB: > { %s1339_s27 = sadd.s32 4294967295, %s1259_s26   ;;  %s884_s28 = sadd.s32 4294967294, %s1259_s26   ;;  %s1259_s26 = sphi %s1318_s26, %s26_s26   ;;  %s1255_s25 = sphi %s1316_s25, %s1569_s25   ;;  %s1251_s24 = sphi %s1314_s24, %s1568_s24   ;;  %s1247_s23 = sphi %s1312_s23, %s1567_s23   ;;  %s1243_s22 = sphi %s1310_s22, %s1566_s22   ;;  %s1239_s21 = sphi %s1308_s21, %s1565_s21  }
   0xf   : > { %p67_p0 = scmp.ne.s32.totalorder %s1243_s22, %s1239_s21  ;;  %p1543_p1 = scmp.eq.s32.totalorder %s1339_s27, 0 }
  0x10   : > { %p211_p3 = scmp.eq.s32.totalorder %s884_s28, 1  ;;  %p885_p5 = scmp.ge.s32.totalorder %s1259_s26, 1 }
  0x11   : > { %p1348_p4 = por %p1543_p1, %p67_p0  ;;  %p218_p7 = scmp.lt.s32.totalorder %s1259_s26, 3 }
  0x12   : > { %p1353_p6 = por %p211_p3, %p67_p0  ;;  %s1261_s8 = smov [#allocation11]  }
  0x13   : > { %p1358_p8 = pnand %p885_p5, %p218_p7  ;;  %s230_s9 = sshll.u32 %s1261_s8, 4  ;;  %s231_s9 = int_to_ptr.vmem [resolvable:$true] %s230_s9 }
  0x14   : > { %s1549_s30 = scalar_select %p1353_p6, 1, 0 }
  0x15   : > { %p970_p9 = pneg %p1358_p8  ;;  %s1262_s11 = smov [#allocation12]  }
  0x16   : > { %s246_s12 = sshll.u32 %s1262_s11, 4  ;;  %s1070_s13 = scalar_lea.vmem %s231_s9, 512  ;;  %s247_s12 = int_to_ptr.vmem [resolvable:$true] %s246_s12 }
  0x17   : > { %p1367_p11 = pnand %p970_p9, %p1543_p1  ;;  %p1071_p13 = scmp.ne.s32.totalorder %s231_s9, %s1070_s13 }
  0x18   : > { %p1078_p5 = scmp.lt.s32.totalorder %s231_s9, %s231_s9  ;;  %p1079_p7 = scmp.lt.s32.totalorder %s1070_s13, %s1070_s13 }
  0x19   : > { %p1061_p12 = pneg %p1367_p11 }
  0x1a   : > { %p1080_p10 = por %p1079_p7, %p1078_p5 }
  0x1b   : > { %p1073_p0 = pnand %p1071_p13, %p1061_p12 }
  0x1d   : > { %p1074_p3 = pneg %p1073_p0 }
  0x1f   : > { %p1081_p9 = pnand %p1080_p10, %p1074_p3 }
  0x21   : > { %1084 = shalt.err (!%p1081_p9)
}
  0x22   : > { %s1263_s14 = smov 128   ;;  %s1264_s15 = smov 8  }
  0x23   : > { %s1552_s2 = sld [smem:[#allocation22_spill]]  ;;  %s1096_s18 = scalar_lea.vmem %s247_s12, 512 }
  0x24   : > { %p1097_p1 = scmp.ne.s32.totalorder %s247_s12, %s1096_s18  ;;  %p1104_p2 = scmp.lt.s32.totalorder %s247_s12, %s247_s12 }
  0x25   : > { %p1105_p6 = scmp.lt.s32.totalorder %s1096_s18, %s1096_s18 }
  0x26   : > { %p1099_p13 = pnand %p1097_p1, %p1061_p12 }
  0x27   : > { %p1106_p5 = por %p1105_p6, %p1104_p2 }
  0x28   : > { %p1100_p0 = pneg %p1099_p13 }
  0x29   : > { %973 = dma.hbm_to_vmem [thread:$0]  (!%p1367_p11), %s1552_s2, 512, %s231_s9, [#allocation10], %s1263_s14, %s1263_s14, %s1264_s15  }
  0x2a   : > { %p1107_p10 = pnand %p1106_p5, %p1100_p0 }
  0x2c   : > { %1110 = shalt.err (!%p1107_p10)
}
  0x2d   : > { %s1553_s4 = sld [smem:[#allocation23_spill]]  ;;  %s45_s28 = sadd.s32 1, %s1255_s25 }
  0x2e   : > { %s54_s8 = sadd.s32 1, %s1247_s23  ;;  %p47_p1 = scmp.ge.s32.totalorder %s45_s28, 2 }
  0x2f   : > { %p61_p2 = scmp.ne.s32.totalorder %s1247_s23, %s1243_s22  ;;  %p62_p6 = scmp.eq.s32.totalorder %s1259_s26, 0 }
  0x30   : > { %p990_p12 = scmp.lt.s32.totalorder %s1259_s26, 2  ;;  %s1571_s28 = smov (%p47_p1, %s45_s28), 0 }
  0x31   : > { %p63_p3 = por %p62_p6, %p61_p2  ;;  %p1554_p7 = scmp.eq.s32.totalorder %s1339_s27, 1 }
  0x32   : > { %s49_s10 = ssub.s32 %s1255_s25, %s1571_s28  ;;  %s263_s11 = sand.u32 1, %s1247_s23  }
  0x33   : > { %976 = dma.hbm_to_vmem [thread:$0]  (!%p1367_p11), %s1553_s4, 512, %s247_s12, [#allocation13], %s1263_s14, %s1263_s14, %s1264_s15  }
  0x34   : > { %p1399_p9 = por %p1554_p7, %p61_p2  ;;  %p52_p13 = scmp.eq.s32.totalorder %s49_s10, 0 }
  0x35   : > { %s889_s12 = sshll.u32 %s263_s11, 3  ;;  %s890_s13 = sshll.u32 %s1255_s25, 7 }
  0x36   : > { %s1408_s14 = scalar_select %p52_p13, %s1247_s23, %s54_s8  }
  0x37   : > { %s1556_s0 = sld [smem:[#allocation20_spill]]  ;;  %s267_s18 = scalar_lea.vmem [#allocation6], %s889_s12 }
  0x38   : > { %s275_s19 = sshll.u32 %s267_s18, 4  ;;  %p1415_p11 = pnand %p990_p12, %p63_p3  ;;  %s276_s19 = int_to_ptr.vmem [resolvable:$true] %s275_s19 }
  0x39   : > { %s1558_s1 = sld [smem:[#allocation21_spill]]  ;;  %s264_s8 = scalar_lea.sflag [#allocation7], %s263_s11 }
  0x3a   : > { %p1113_p0 = pneg %p1415_p11  ;;  %s1124_s15 = scalar_lea.vmem %s276_s19, 128 }
  0x3b   : > { %p1125_p5 = scmp.ne.s32.totalorder %s276_s19, %s1124_s15  ;;  %s1265_s16 = smov [#allocation6]  }
  0x3c   : > { %s1129_s18 = sshll.u32 %s1265_s16, 4  ;;  %s1130_s18 = int_to_ptr.vmem [resolvable:$false] %s1129_s18 }
  0x3d   : > { %s273_s17 = scalar_lea.hbm %s1556_s0, %s890_s13  ;;  %p1127_p10 = pnand %p1125_p5, %p1113_p0 }
  0x3e   : > { %s1131_s0 = scalar_lea.vmem %s1130_s18, 256  ;;  %p1132_p2 = scmp.lt.s32.totalorder %s276_s19, %s1130_s18 }
  0x3f   : > { %s1422_s4 = scalar_lea.hbm %s1558_s1, %s890_s13  ;;  %p1128_p1 = pneg %p1127_p10 }
  0x40   : > { %p1133_p6 = scmp.lt.s32.totalorder %s1131_s0, %s1124_s15 }
  0x42   : > { %p1134_p12 = por %p1133_p6, %p1132_p2 }
  0x44   : > { %p1135_p3 = pnand %p1134_p12, %p1128_p1 }
  0x46   : > { %1138 = shalt.err (!%p1135_p3)
}
  0x47   : > { %980 = dma.hbm_to_vmem [thread:$0]  (!%p1415_p11), %s273_s17, 128, %s276_s19, %s264_s8  }
  0x48   : > { %s282_s2 = sand.u32 1, %s1259_s26   ;;  %s286_s11 = scalar_lea.vmem [#allocation9], %s889_s12 }
  0x49   : > { %s294_s13 = sshll.u32 %s286_s11, 4  ;;  %s283_s10 = scalar_lea.sflag [#allocation10], %s282_s2  ;;  %s295_s13 = int_to_ptr.vmem [resolvable:$true] %s294_s13 }
  0x4a   : > { %s1152_s1 = scalar_lea.vmem %s295_s13, 128  ;;  %s1266_s0 = smov [#allocation9]  }
  0x4b   : > { %p1153_p7 = scmp.ne.s32.totalorder %s295_s13, %s1152_s1  ;;  %s1157_s15 = sshll.u32 %s1266_s0, 4  ;;  %s1158_s15 = int_to_ptr.vmem [resolvable:$false] %s1157_s15 }
  0x4c   : > { %s1159_s16 = scalar_lea.vmem %s1158_s15, 256  ;;  %p1160_p10 = scmp.lt.s32.totalorder %s295_s13, %s1158_s15 }
  0x4d   : > { %p1155_p13 = pnand %p1153_p7, %p1113_p0  ;;  %p1161_p1 = scmp.lt.s32.totalorder %s1159_s16, %s1152_s1 }
  0x4f   : > { %p1156_p5 = pneg %p1155_p13  ;;  %p1162_p2 = por %p1161_p1, %p1160_p10 }
  0x51   : > { %p1163_p6 = pnand %p1162_p2, %p1156_p5 }
  0x53   : > { %1166 = shalt.err (!%p1163_p6)
}
  0x54   : > { %983 = dma.hbm_to_vmem [thread:$0]  (!%p1415_p11), %s1422_s4, 128, %s295_s13, %s283_s10  }
  0x55   : > { %303 = sbr.rel (%p1358_p8) target bundleno = 1091 (0x443), region = 44  ;;  %s1441_s12 = sand.u32 (!%p1358_p8), 1, %s1243_s22  }
  0x56   : > { %s1444_s17 = sshll.u32 (!%p1358_p8), %s1441_s12, 3  ;;  %s306_s1 = scalar_lea.sflag (!%p1358_p8), [#allocation7], %s1441_s12 }
  0x57   : > { %s309_s19 = scalar_lea.vmem (!%p1358_p8), [#allocation6], %s1444_s17 }
  0x5a   : > { %1218 = dma.done.wait (%p1348_p4), %s306_s1, 128  }
  0x5b   : > { %1220 = vsyncadd (%p1348_p4), %s306_s1, 4294967168  ;;  %s314_s4 = sand.u32 1, %s1339_s27   ;;  %s318_s20 = scalar_lea.vmem [#allocation9], %s1444_s17 }
  0x5c   : > { %s315_s7 = scalar_lea.sflag [#allocation10], %s314_s4 }
  0x5d   : > { %1222 = dma.done.wait (%p1348_p4), %s315_s7, 128  }
  0x5e   : > { %1224 = vsyncadd (%p1348_p4), %s315_s7, 4294967168  ;;  %p1559_p8 = scmp.eq.s32.totalorder %s1339_s27, 0 }
  0x60   : > { %1226 = dma.done.wait (%p1559_p8), [#allocation10], 512   ;;  %p1560_p11 = pmov %p1559_p8 }
  0x61   : > { %p1561_p0 = pmov %p1559_p8 }
  0x62   : > { %1228 = vsyncadd (%p1560_p11), [#allocation10], 4294966784 }
  0x63   : > { %1230 = dma.done.wait (%p1561_p0), [#allocation13], 512   ;;  %p1562_p12 = pmov %p1561_p0 }
  0x64   : > { %vm376_vm0 = vcmask 261120   ;;  %v1267_v0 = vmov 0.0   ;;  %vm1268_vm1 = vmmov 0   ;;  %v368_v1 = vld [vmem:[#allocation11 + $0x18] sm:$0xff]  ;;  %v367_v2 = vld [vmem:[#allocation11 + $0x10] sm:$0xff]  ;;  %v366_v5 = vld [vmem:[#allocation11 + $0x8] sm:$0xff] }
  0x65   : > { %1232 = vsyncadd (%p1562_p12), [#allocation13], 4294966784  ;;  %924 = vmatprep.subr.mxu0 %v1267_v0  ;;  %935 = vmatprep.subr.mxu1 %v1267_v0  ;;  %454 = vst.msk [vmem:[#allocation5] sm:$0xff] %vm376_vm0, %v1267_v0  ;;  %v459_v3 = vld [vmem:[#allocation12 + $0x18] sm:$0xff]  ;;  %v458_v4 = vld [vmem:[#allocation12 + $0x10] sm:$0xff]  ;;  %s1269_s2 = smov 96  }
  0x66   : > { %932 = vmatprep.mubr.msk.f32.mxu0 %vm1268_vm1, %v1267_v0  ;;  %943 = vmatprep.mubr.msk.f32.mxu1 %vm1268_vm1, %v1267_v0  ;;  %v457_v6 = vld [vmem:[#allocation12 + $0x8] sm:$0xff]  ;;  %v365_v7 = vld [vmem:[#allocation11] sm:$0xff]  ;;  %v455_v10 = vld [vmem:[%s318_s20] sm:$0xff]  ;;  %vm451_vm2 = vcmask 7168   ;;  %v1270_v20 = vmov -inf   ;;  %vm619_vm3 = vcmask 64512  }
  0x67   : > { %925 = vmatpush3.msra.mxu0 %v368_v1  ;;  %936 = vmatpush3.msra.mxu1 %v459_v3  ;;  %v456_v8 = vld [vmem:[#allocation12] sm:$0xff]  ;;  %452 = vst.msk [vmem:[#allocation3] sm:$0xff] %vm451_vm2, %v1270_v20  ;;  %453 = vst.msk [vmem:[#allocation4] sm:$0xff] %vm451_vm2, %v1267_v0  ;;  %v1271_v25 = vmov 0   ;;  %s907_s11 = sshll.u32 %s1251_s24, 7  ;;  %s359_s13 = scalar_lea.vmem [#allocation14], %s1444_s17 }
  0x68   : > { %926 = vmatprep.subr.mxu0 %v1267_v0  ;;  %937 = vmatprep.subr.mxu1 %v1267_v0  ;;  %v364_v9 = vld [vmem:[%s309_s19] sm:$0xff]  ;;  %s757_s10 = sshll.u32 %s359_s13, 4  ;;  %s755_s16 = scalar_lea.hbm %s1542_s6, %s907_s11  ;;  %s758_s10 = int_to_ptr.vmem [resolvable:$true] %s757_s10 }
  0x69   : > { %927 = vmatpush3.msra.mxu0 %v367_v2  ;;  %938 = vmatpush3.msra.mxu1 %v458_v4  ;;  %v899_v11 = vld [vmem:[%s1539_s3] ss:$0 sm:$0xff]  ;;  %s743_s1 = scalar_lea.sflag [#allocation8], %s1441_s12  ;;  %s1167_s19 = scalar_lea.vmem %s758_s10, 128 }
  0x6a   : > { %928 = vmatprep.subr.mxu0 %v1267_v0  ;;  %939 = vmatprep.subr.mxu1 %v1267_v0  ;;  %v901_v12 = vld [vmem:[%s1541_s5] ss:$0 sm:$0xff]  ;;  %p1168_p4 = scmp.ne.s32.totalorder %s758_s10, %s1167_s19  ;;  %s1272_s4 = smov [#allocation14]  }
  0x6b   : > { %929 = vmatpush3.msra.mxu0 %v366_v5  ;;  %940 = vmatpush3.msra.mxu1 %v457_v6  ;;  %s1171_s24 = sshll.u32 %s1272_s4, 4  ;;  %s1172_s24 = int_to_ptr.vmem [resolvable:$false] %s1171_s24 }
  0x6c   : > { %930 = vmatprep.subr.mxu0 %v1267_v0  ;;  %941 = vmatprep.subr.mxu1 %v1267_v0  ;;  %v643_v43 = vld [vmem:[#allocation5] sm:$0xff]  ;;  %p1169_p3 = pnand %p1168_p4, %p1399_p9  ;;  %s1173_s17 = scalar_lea.vmem %s1172_s24, 256 }
  0x6d   : > { %931 = vmatpush3.msra.mxu0 %v365_v7  ;;  %942 = vmatpush3.msra.mxu1 %v456_v8  ;;  %p1174_p13 = scmp.lt.s32.totalorder %s758_s10, %s1172_s24  ;;  %p1175_p5 = scmp.lt.s32.totalorder %s1173_s17, %s1167_s19 }
  0x6e   : > { %933 = vmatmul.mubr.msk.f32.vlgmr.msra.gmra.mxu0 %vm376_vm0, %v364_v9  ;;  %944 = vmatmul.mubr.msk.f32.vlgmr.msra.gmra.mxu1 %vm376_vm0, %v455_v10  ;;  %v618_v26 = vld [vmem:[#allocation3] sm:$0xff]  ;;  %v635_v37 = vld [vmem:[#allocation4] sm:$0xff]  ;;  %p1170_p7 = pneg %p1169_p3 }
  0x6f   : > { %946 = vmatprep.subr.mxu0 %v1267_v0  ;;  %948 = vmatprep.mubr.msk.f32.mxu0 %vm1268_vm1, %v1267_v0  ;;  %p1176_p10 = por %p1175_p5, %p1174_p13 }
  0x70   : > { %951 = vmatprep.subr.mxu1 %v1267_v0  ;;  %953 = vmatprep.mubr.msk.f32.mxu1 %vm1268_vm1, %v1267_v0 }
  0x71   : > { %1051 = vset.pattern.permute.xlu0 %v1271_v25  ;;  %1052 = vset.pattern.permute.xlu1 %v1271_v25  ;;  %p1177_p1 = pnand %p1176_p10, %p1170_p7 }
 0x12e   : > { %v446_v13 = vpop.f32.mrf.mxu0  ;;  %v537_v14 = vpop.f32.mrf.mxu1 }
 0x12f   : > { %v447_v15 = vadd.f32 %v899_v11, %v446_v13  ;;  %v538_v16 = vadd.f32 %v901_v12, %v537_v14 }
 0x130   : > { %v934_v17 = vpop.f32.mrf.mxu0  ;;  %v945_v18 = vpop.f32.mrf.mxu1 }
 0x131   : > { %450 = vst.msk [vmem:[#allocation2] sm:$0xff] %vm376_vm0, %v447_v15  ;;  %650 = vrot.lane.b32.xlu1 %v538_v16, %s1269_s2  ;;  %947 = vmatpush3.xpose.msk.msra.mxu0 %vm376_vm0, %v538_v16 }
 0x138   : > { %v541_v19 = vld [vmem:[#allocation2] sm:$0xff] }
 0x139   : > { %949 = vmatmul.mubr.msk.f32.vlgmr.msra.gmra.mxu0 %vm376_vm0, %v541_v19 }
 0x1a3   : > { %v651_v21 = vpop.permute.xlu1 %650 }
 0x1a4   : > { %952 = vmatpush3.msra.mxu1 %v651_v21 }
 0x1f9   : > { %v614_v22 = vpop.f32.mrf.mxu0 }
 0x1fa   : > { %v620_v23 = vsel %vm619_vm3, %v614_v22, -inf }
 0x1fb   : > { %621 = vmax.xlane.f32.xlu0 %v620_v23  ;;  %v950_v24 = vpop.f32.mrf.mxu0 }
 0x284   : > { %v622_v27 = vpop.xlane.xlu0 %621 }
 0x285   : > { %v623_v28 = vmax.f32 %v618_v26, %v622_v27 }
 0x287   : > { %v624_v29 = vsub.f32 %v618_v26, %v623_v28  ;;  %728 = vst.msk [vmem:[#allocation3] sm:$0xff] %vm451_vm2, %v623_v28  ;;  %629 = vperm.xlu0 %1051, %v623_v28  }
 0x289   : > { %v625_v34 = vmul.f32 1.442695, %v624_v29 }
 0x302   : > { %v630_v30 = vpop.permute.xlu0 %629 }
 0x303   : > { %v632_v31 = vsub.f32 %v614_v22, %v630_v30 }
 0x305   : > { %v633_v32 = vmul.f32 1.442695, %v632_v31 }
 0x307   : > { %1053 = vpow2.f32 %v633_v32 }
 0x308   : > { %1055 = vpow2.f32 %v625_v34 }
 0x314   : > { %v1054_v33 = vpop.eup %1053 }
 0x315   : > { %954 = vmatmul.mubr.msk.f32.vlgmr.msra.gmra.mxu1 %vm619_vm3, %v1054_v33  ;;  %v637_v35 = vsel %vm619_vm3, %v1054_v33, 0.0  ;;  %v1056_v36 = vpop.eup %1055 }
 0x316   : > { %638 = vadd.xlane.f32.xlu1 %v637_v35  ;;  %v636_v38 = vmul.f32 %v1056_v36, %v635_v37 }
 0x327   : > { %646 = vperm.xlu1 %1052, %v1056_v36  }
 0x39f   : > { %v639_v39 = vpop.xlane.xlu1 %638 }
 0x3a0   : > { %v640_v40 = vadd.f32 %v639_v39, %v636_v38 }
 0x3a2   : > { %642 = vst.msk [vmem:[#allocation4] sm:$0xff] %vm451_vm2, %v640_v40 }
 0x3a3   : > { %v647_v44 = vpop.permute.xlu1 %646 }
 0x3a4   : > { %v649_v45 = vmul.f32 %v647_v44, %v643_v43 }
 0x3a9   : > { %v732_v41 = vld [vmem:[#allocation4] sm:$0xff] }
 0x3aa   : > { %1057 = vrcp.f32 %v732_v41 }
 0x3b7   : > { %v1058_v42 = vpop.eup %1057 }
 0x3b8   : > { %737 = vperm.xlu0 %1051, %v1058_v42  }
 0x3d5   : > { %v722_v46 = vpop.f32.mrf.mxu1 }
 0x3d6   : > { %v726_v47 = vadd.f32 %v722_v46, %v649_v45 }
 0x3d7   : > { %v955_v48 = vpop.f32.mrf.mxu1 }
 0x3d8   : > { %727 = vst.msk [vmem:[#allocation5] sm:$0xff] %vm376_vm0, %v726_v47 }
 0x3df   : > { %v734_v49 = vld [vmem:[#allocation5] sm:$0xff] }
 0x433   : > { %v738_v50 = vpop.permute.xlu0 %737 }
 0x434   : > { %v740_v51 = vmul.f32 %v738_v50, %v734_v49 }
 0x436   : > { %741 = vst.msk [vmem:[%s359_s13] sm:$0xff] %vm376_vm0, %v740_v51 }
 0x437   : > { %1180 = shalt.err (!%p1177_p1)
}
 0x438   : > { %s1181_s7 = scalar_lea.hbm %s755_s16, 128  ;;  %s1185_s27 = scalar_lea.hbm %s1542_s6, 256 }
 0x439   : > { %p1182_p2 = scmp.ne.s32.totalorder %s755_s16, %s1181_s7  ;;  %p1186_p11 = scmp.lt.s32.totalorder %s755_s16, %s1542_s6 }
 0x43a   : > { %p1187_p0 = scmp.lt.s32.totalorder %s1185_s27, %s1181_s7 }
 0x43b   : > { %p1183_p6 = pnand %p1182_p2, %p1399_p9 }
 0x43c   : > { %p1188_p12 = por %p1187_p0, %p1186_p11 }
 0x43d   : > { %p1184_p8 = pneg %p1183_p6 }
 0x43f   : > { %p1189_p4 = pnand %p1188_p12, %p1184_p8 }
 0x441   : > { %1192 = shalt.err (!%p1189_p4)
}
 0x442   : > { %968 = dma.vmem_to_hbm [thread:$0]  (%p1399_p9), %s758_s10, 128, %s755_s16, %s743_s1  }
 0x443 PF: > { %s769_s18 = sand.u32 1, %s1239_s21   ;;  %p1563_p3 = scmp.ne.s32.totalorder %s1549_s30, 0 }
 0x444   : > { %p1564_p7 = scmp.ge.s32.totalorder %s1259_s26, 2  ;;  %s770_s2 = scalar_lea.sflag [#allocation8], %s769_s18 }
 0x446   : > { %p985_p13 = pnand %p1564_p7, %p1563_p3 }
 0x448   : > { %p986_p5 = pneg %p985_p13 }
 0x44a   : > { %1234 = dma.done.wait (%p986_p5), %s770_s2, 128  }
 0x44b   : > { %1236 = vsyncadd (%p986_p5), %s770_s2, 4294967168  ;;  %s26_s26 = sadd.s32 1, %s1259_s26   ;;  %s1565_s21 = smov %s1243_s22 }
 0x44c   : > { %p23_p10 = scmp.ge.s32.totalorder %s26_s26, 4   ;;  %s1566_s22 = smov %s1247_s23 }
 0x44d   : > { %s1567_s23 = smov %s1408_s14  ;;  %s1568_s24 = smov %s1255_s25 }
 0x44e   : > { %s1569_s25 = smov %s1571_s28  ;;  %25 = sbr.rel (!%p23_p10) target bundleno = 14 (0xe), region = 118 }
 0x453   :  { %775 = vsyncpa [#allocation7], 1 }
 0x454   :  { %777 = vsyncpa [#allocation7 + $0x1], 1 }
 0x455   :  { %778 = vsyncpa [#allocation10], 1 }
 0x456   :  { %780 = vsyncpa [#allocation10 + $0x1], 1 }
 0x457   :  { %781 = vsyncpa [#allocation13], 1 }
 0x458   :  { %782 = vsyncpa [#allocation8], 1 }
 0x459   :  { %784 = vsyncpa [#allocation8 + $0x1], 1 }

</bundles_post_ra>
